<compile_context>
chip_gen: v7x
topology: tpu7x:2x2x1
jax: 0.10.0
libtpu: 0.0.40
codegen_flags: <defaults>
</compile_context>

<pallas_src>
import math

import jax
import jax.numpy as jnp
from jax.experimental import pallas as pl
from jax.experimental.pallas import tpu as pltpu

NOISY_LAYER_STD = 0.1  # Config.NOISY_LAYER_STD in the reference DeepRL codebase


def _round_up(x, m):
    return (x + m - 1) // m * m


# ----------------------------- Pallas kernels ------------------------------ #
def _noisy_linear_kernel(x_ref, wmu_ref, wsig_ref, eps_in_ref, eps_out_ref,
                         bias_ref, o_ref, acc_ref):
    """Training path: y = x@w_mu + eps_out * ((x*eps_in)@w_sigma) + bias."""
    k = pl.program_id(2)

    @pl.when(k == 0)
    def _():
        acc_ref[...] = jnp.zeros_like(acc_ref)

    x = x_ref[...]                                  # (tm, tk)
    x_noisy = x * eps_in_ref[...]                   # column-scale by eps_in (1, tk)
    acc_ref[...] += (
        jnp.dot(x, wmu_ref[...], preferred_element_type=jnp.float32)
        + jnp.dot(x_noisy, wsig_ref[...], preferred_element_type=jnp.float32)
        * eps_out_ref[...]                          # row-noise scale (1, tn)
    )

    @pl.when(k == pl.num_programs(2) - 1)
    def _():
        o_ref[...] = (acc_ref[...] + bias_ref[...]).astype(o_ref.dtype)


def _plain_linear_kernel(x_ref, wmu_ref, bias_ref, o_ref, acc_ref):
    """Eval path: y = x@w_mu + bias_mu (no sigma / epsilon traffic at all)."""
    k = pl.program_id(2)

    @pl.when(k == 0)
    def _():
        acc_ref[...] = jnp.zeros_like(acc_ref)

    acc_ref[...] += jnp.dot(x_ref[...], wmu_ref[...],
                            preferred_element_type=jnp.float32)

    @pl.when(k == pl.num_programs(2) - 1)
    def _():
        o_ref[...] = (acc_ref[...] + bias_ref[...]).astype(o_ref.dtype)


# -------------------------------- wrapper ---------------------------------- #
def noisy_linear(x, weight_mu_t, weight_sigma_t, eps_in, eps_out,
                 bias_mu, bias_sigma, bias_epsilon, training=True,
                 tile_m=128, tile_n=256, tile_k=512):
    """Pallas implementation of NoisyLinear.forward.

    weight_mu_t / weight_sigma_t are stored pre-transposed: (in_features, out_features).
    eps_in (in_features,), eps_out (out_features,) are the factorized noise vectors
    (weight_epsilon = outer(eps_out, eps_in) is never materialized).
    """
    batch, in_features = x.shape
    k_dim, out_features = weight_mu_t.shape
    assert k_dim == in_features

    # Tile sizes: (8, 128)-aligned, capped so double-buffered tiles stay well
    # under the 32 MiB scoped-VMEM default (v7x-safe).
    tm = min(tile_m, _round_up(batch, 8))
    tn = min(tile_n, _round_up(out_features, 128))
    tk = min(tile_k, _round_up(in_features, 128))
    Mp = _round_up(batch, tm)
    Np = _round_up(out_features, tn)
    Kp = _round_up(in_features, tk)

    dt = x.dtype
    xp = jnp.zeros((Mp, Kp), dt).at[:batch, :in_features].set(x)
    wmu_p = jnp.zeros((Kp, Np), weight_mu_t.dtype).at[:in_features, :out_features].set(weight_mu_t)

    b_eff = bias_mu + bias_sigma * bias_epsilon if training else bias_mu
    b_p = jnp.zeros((1, Np), b_eff.dtype).at[0, :out_features].set(b_eff)

    grid = (Mp // tm, Np // tn, Kp // tk)
    x_spec = pl.BlockSpec((tm, tk), lambda i, j, k: (i, k))
    w_spec = pl.BlockSpec((tk, tn), lambda i, j, k: (k, j))
    nvec_spec = pl.BlockSpec((1, tn), lambda i, j, k: (0, j))
    kvec_spec = pl.BlockSpec((1, tk), lambda i, j, k: (0, k))
    out_spec = pl.BlockSpec((tm, tn), lambda i, j, k: (i, j))
    cparams = pltpu.CompilerParams(
        dimension_semantics=("parallel", "parallel", "arbitrary"))

    if training:
        wsig_p = jnp.zeros((Kp, Np), weight_sigma_t.dtype).at[:in_features, :out_features].set(weight_sigma_t)
        eps_in_p = jnp.zeros((1, Kp), eps_in.dtype).at[0, :in_features].set(eps_in)
        eps_out_p = jnp.zeros((1, Np), eps_out.dtype).at[0, :out_features].set(eps_out)
        out_p = pl.pallas_call(
            _noisy_linear_kernel,
            out_shape=jax.ShapeDtypeStruct((Mp, Np), dt),
            grid_spec=pltpu.PrefetchScalarGridSpec(
                num_scalar_prefetch=0,
                grid=grid,
                in_specs=[x_spec, w_spec, w_spec, kvec_spec, nvec_spec, nvec_spec],
                out_specs=out_spec,
                scratch_shapes=[pltpu.VMEM((tm, tn), jnp.float32)]),
            compiler_params=cparams,
        )(xp, wmu_p, wsig_p, eps_in_p, eps_out_p, b_p)
    else:
        out_p = pl.pallas_call(
            _plain_linear_kernel,
            out_shape=jax.ShapeDtypeStruct((Mp, Np), dt),
            grid_spec=pltpu.PrefetchScalarGridSpec(
                num_scalar_prefetch=0,
                grid=grid,
                in_specs=[x_spec, w_spec, nvec_spec],
                out_specs=out_spec,
                scratch_shapes=[pltpu.VMEM((tm, tn), jnp.float32)]),
            compiler_params=cparams,
        )(xp, wmu_p, b_p)

    return out_p[:batch, :out_features]


# ------------------------- parameter / noise setup ------------------------- #
def _transform_noise(x):
    # x.sign() * sqrt(|x|)
    return jnp.sign(x) * jnp.sqrt(jnp.abs(x))


def init_noisy_linear(key, in_features, out_features, std_init=0.4):
    """Deterministic replica of NoisyLinear.__init__ / reset_parameters / reset_noise.

    Weights are stored pre-transposed (in_features, out_features); noise is kept
    factorized (eps_in, eps_out) instead of the full weight_epsilon matrix.
    """
    k_wmu, k_bmu, k_nin, k_now, k_nob = jax.random.split(key, 5)

    mu_range = 1.0 / math.sqrt(in_features)
    weight_mu = jax.random.uniform(k_wmu, (out_features, in_features),
                                   minval=-mu_range, maxval=mu_range,
                                   dtype=jnp.float32)
    weight_sigma = jnp.full((out_features, in_features),
                            std_init / math.sqrt(in_features), dtype=jnp.float32)
    bias_mu = jax.random.uniform(k_bmu, (out_features,),
                                 minval=-mu_range, maxval=mu_range,
                                 dtype=jnp.float32)
    bias_sigma = jnp.full((out_features,),
                          std_init / math.sqrt(out_features), dtype=jnp.float32)

    # reset_noise(): factorized Gaussian noise
    noise_in = NOISY_LAYER_STD * jax.random.normal(k_nin, (in_features,), jnp.float32)
    noise_out_weight = NOISY_LAYER_STD * jax.random.normal(k_now, (out_features,), jnp.float32)
    noise_out_bias = NOISY_LAYER_STD * jax.random.normal(k_nob, (out_features,), jnp.float32)

    eps_in = _transform_noise(noise_in)
    eps_out = _transform_noise(noise_out_weight)     # weight_epsilon = outer(eps_out, eps_in)
    bias_epsilon = _transform_noise(noise_out_bias)

    return dict(
        # kernel-facing storage (pre-transposed, factorized noise)
        weight_mu_t=weight_mu.T, weight_sigma_t=weight_sigma.T,
        eps_in=eps_in, eps_out=eps_out,
        bias_mu=bias_mu, bias_sigma=bias_sigma, bias_epsilon=bias_epsilon,
        # PyTorch-layout copies kept only for the reference check in __main__
        weight_mu=weight_mu, weight_sigma=weight_sigma,
    )


# ---------------------------------- main ----------------------------------- #
if __name__ == "__main__":
    key = jax.random.PRNGKey(0)
    k_params, k_x = jax.random.split(key)

    batch, in_features, out_features = 2, 32, 64
    params = init_noisy_linear(k_params, in_features, out_features, std_init=0.4)
    x = jax.random.normal(k_x, (batch, in_features), dtype=jnp.float32)

    fwd = jax.jit(noisy_linear, static_argnames=("training",))

    # Training mode (noisy weights) and eval mode (noise-free kernel)
    y_train = fwd(x, params["weight_mu_t"], params["weight_sigma_t"],
                  params["eps_in"], params["eps_out"],
                  params["bias_mu"], params["bias_sigma"], params["bias_epsilon"],
                  training=True)
    y_eval = fwd(x, params["weight_mu_t"], params["weight_sigma_t"],
                 params["eps_in"], params["eps_out"],
                 params["bias_mu"], params["bias_sigma"], params["bias_epsilon"],
                 training=False)
    jax.block_until_ready((y_train, y_eval))

    # Pure-JAX references in the original PyTorch layout
    w_eps = jnp.outer(params["eps_out"], params["eps_in"])
    w_eff = params["weight_mu"] + params["weight_sigma"] * w_eps
    b_eff = params["bias_mu"] + params["bias_sigma"] * params["bias_epsilon"]
    y_train_ref = x @ w_eff.T + b_eff
    y_eval_ref = x @ params["weight_mu"].T + params["bias_mu"]

    assert y_train.shape == (batch, out_features)
    assert y_eval.shape == (batch, out_features)
    assert jnp.allclose(y_train, y_train_ref, atol=1e-5, rtol=1e-5)
    assert jnp.allclose(y_eval, y_eval_ref, atol=1e-5, rtol=1e-5)

    # TODO(synk): for per-step RL loops at these tiny shapes, fuse this layer with
    # adjacent NoisyLinear layers / activations into one pallas_call to amortize
    # launch overhead.
    print("KERNEL_OK")
</pallas_src>

<mosaic_0001>
module attributes {stable_mosaic.version = 11 : i64} {
  func.func @_noisy_linear_kernel(%arg0: i32, %arg1: i32, %arg2: i32, %arg3: memref<8x128xf32, #tpu.memory_space<vmem>>, %arg4: memref<128x128xf32, #tpu.memory_space<vmem>>, %arg5: memref<128x128xf32, #tpu.memory_space<vmem>>, %arg6: memref<1x128xf32, #tpu.memory_space<vmem>>, %arg7: memref<1x128xf32, #tpu.memory_space<vmem>>, %arg8: memref<1x128xf32, #tpu.memory_space<vmem>>, %arg9: memref<8x128xf32, #tpu.memory_space<vmem>>, %arg10: memref<8x128xf32, #tpu.memory_space<vmem>>) attributes {dimension_semantics = [#tpu.dimension_semantics<parallel>, #tpu.dimension_semantics<parallel>, #tpu.dimension_semantics<arbitrary>], iteration_bounds = array<i64: 1, 1, 1>, scalar_prefetch = 0 : i64, scratch_operands = 1 : i64, tpu.core_type = #tpu.core_type<tc>, window_params = [{transform_indices = @transform_0, window_bounds = array<i64: 8, 128>}, {transform_indices = @transform_1, window_bounds = array<i64: 128, 128>}, {transform_indices = @transform_2, window_bounds = array<i64: 128, 128>}, {transform_indices = @transform_3, window_bounds = array<i64: 1, 128>}, {transform_indices = @transform_4, window_bounds = array<i64: 1, 128>}, {transform_indices = @transform_5, window_bounds = array<i64: 1, 128>}, {transform_indices = @transform_6, window_bounds = array<i64: 8, 128>}]} {
    %c0_i32 = arith.constant 0 : i32
    %0 = arith.cmpi eq, %arg2, %c0_i32 : i32
    %1 = arith.extui %0 : i1 to i32
    %c0_i32_0 = arith.constant 0 : i32
    %2 = arith.cmpi ne, %1, %c0_i32_0 : i32
    scf.if %2 {
      %cst_17 = arith.constant 0.000000e+00 : f32
      %21 = vector.broadcast %cst_17 : f32 to vector<8x128xf32>
      %c0_18 = arith.constant 0 : index
      %c0_19 = arith.constant 0 : index
      %22 = vector.load %arg10[%c0_18, %c0_19] : memref<8x128xf32, #tpu.memory_space<vmem>>, vector<8x128xf32>
      tpu.vector_store %arg10[%c0_18, %c0_19], %21 {strides = array<i32>} : memref<8x128xf32, #tpu.memory_space<vmem>>, vector<8x128xf32>,
    } else {
    }
    %c0 = arith.constant 0 : index
    %c0_1 = arith.constant 0 : index
    %3 = vector.load %arg3[%c0, %c0_1] : memref<8x128xf32, #tpu.memory_space<vmem>>, vector<8x128xf32>
    %c0_2 = arith.constant 0 : index
    %c0_3 = arith.constant 0 : index
    %4 = vector.load %arg6[%c0_2, %c0_3] : memref<1x128xf32, #tpu.memory_space<vmem>>, vector<1x128xf32>
    %5 = vector.broadcast %4 : vector<1x128xf32> to vector<8x128xf32>
    %6 = arith.mulf %3, %5 : vector<8x128xf32>
    %c0_4 = arith.constant 0 : index
    %c0_5 = arith.constant 0 : index
    %7 = vector.load %arg10[%c0_4, %c0_5] : memref<8x128xf32, #tpu.memory_space<vmem>>, vector<8x128xf32>
    %c0_6 = arith.constant 0 : index
    %c0_7 = arith.constant 0 : index
    %8 = vector.load %arg4[%c0_6, %c0_7] : memref<128x128xf32, #tpu.memory_space<vmem>>, vector<128x128xf32>
    %cst = arith.constant dense<0.000000e+00> : vector<8x128xf32>
    %9 = tpu.matmul %3, %8, %cst {dimension_numbers = #tpu.dot_dimension_numbers<[1], [0], [0], [1], [0, 0, 1, 1], [], []>} : vector<8x128xf32>, vector<128x128xf32>, vector<8x128xf32> -> vector<8x128xf32>
    %c0_8 = arith.constant 0 : index
    %c0_9 = arith.constant 0 : index
    %10 = vector.load %arg5[%c0_8, %c0_9] : memref<128x128xf32, #tpu.memory_space<vmem>>, vector<128x128xf32>
    %cst_10 = arith.constant dense<0.000000e+00> : vector<8x128xf32>
    %11 = tpu.matmul %6, %10, %cst_10 {dimension_numbers = #tpu.dot_dimension_numbers<[1], [0], [0], [1], [0, 0, 1, 1], [], []>} : vector<8x128xf32>, vector<128x128xf32>, vector<8x128xf32> -> vector<8x128xf32>
    %c0_11 = arith.constant 0 : index
    %c0_12 = arith.constant 0 : index
    %12 = vector.load %arg7[%c0_11, %c0_12] : memref<1x128xf32, #tpu.memory_space<vmem>>, vector<1x128xf32>
    %13 = vector.broadcast %12 : vector<1x128xf32> to vector<8x128xf32>
    %14 = arith.mulf %11, %13 : vector<8x128xf32>
    %15 = arith.addf %9, %14 : vector<8x128xf32>
    %16 = arith.addf %7, %15 : vector<8x128xf32>
    %c0_13 = arith.constant 0 : index
    %c0_14 = arith.constant 0 : index
    %17 = vector.load %arg10[%c0_13, %c0_14] : memref<8x128xf32, #tpu.memory_space<vmem>>, vector<8x128xf32>
    tpu.vector_store %arg10[%c0_13, %c0_14], %16 {strides = array<i32>} : memref<8x128xf32, #tpu.memory_space<vmem>>, vector<8x128xf32>,
    %c0_i32_15 = arith.constant 0 : i32
    %18 = arith.cmpi eq, %arg2, %c0_i32_15 : i32
    %19 = arith.extui %18 : i1 to i32
    %c0_i32_16 = arith.constant 0 : i32
    %20 = arith.cmpi ne, %19, %c0_i32_16 : i32
    scf.if %20 {
      %c0_17 = arith.constant 0 : index
      %c0_18 = arith.constant 0 : index
      %21 = vector.load %arg10[%c0_17, %c0_18] : memref<8x128xf32, #tpu.memory_space<vmem>>, vector<8x128xf32>
      %c0_19 = arith.constant 0 : index
      %c0_20 = arith.constant 0 : index
      %22 = vector.load %arg8[%c0_19, %c0_20] : memref<1x128xf32, #tpu.memory_space<vmem>>, vector<1x128xf32>
      %23 = vector.broadcast %22 : vector<1x128xf32> to vector<8x128xf32>
      %24 = arith.addf %21, %23 : vector<8x128xf32>
      %c0_21 = arith.constant 0 : index
      %c0_22 = arith.constant 0 : index
      %25 = vector.load %arg9[%c0_21, %c0_22] : memref<8x128xf32, #tpu.memory_space<vmem>>, vector<8x128xf32>
      tpu.vector_store %arg9[%c0_21, %c0_22], %24 {strides = array<i32>} : memref<8x128xf32, #tpu.memory_space<vmem>>, vector<8x128xf32>,
    } else {
    }
    return
  }
  func.func @transform_0(%arg0: i32, %arg1: i32, %arg2: i32) -> (i32, i32) {
    %c0_i32 = arith.constant 0 : i32
    return %arg0, %arg2 : i32, i32
  }
  func.func @transform_1(%arg0: i32, %arg1: i32, %arg2: i32) -> (i32, i32) {
    %c0_i32 = arith.constant 0 : i32
    return %arg2, %arg1 : i32, i32
  }
  func.func @transform_2(%arg0: i32, %arg1: i32, %arg2: i32) -> (i32, i32) {
    %c0_i32 = arith.constant 0 : i32
    return %arg2, %arg1 : i32, i32
  }
  func.func @transform_3(%arg0: i32, %arg1: i32, %arg2: i32) -> (i32, i32) {
    %c0_i32 = arith.constant 0 : i32
    %c0_i32_0 = arith.constant 0 : i32
    return %c0_i32, %arg2 : i32, i32
  }
  func.func @transform_4(%arg0: i32, %arg1: i32, %arg2: i32) -> (i32, i32) {
    %c0_i32 = arith.constant 0 : i32
    %c0_i32_0 = arith.constant 0 : i32
    return %c0_i32, %arg1 : i32, i32
  }
  func.func @transform_5(%arg0: i32, %arg1: i32, %arg2: i32) -> (i32, i32) {
    %c0_i32 = arith.constant 0 : i32
    %c0_i32_0 = arith.constant 0 : i32
    return %c0_i32, %arg1 : i32, i32
  }
  func.func @transform_6(%arg0: i32, %arg1: i32, %arg2: i32) -> (i32, i32) {
    %c0_i32 = arith.constant 0 : i32
    return %arg0, %arg1 : i32, i32
  }
}

</mosaic_0001>

<bundles_post_ra>
// kernel: noisy_linear.1
= control target key start
LH: loop header
LB: loop body
LE: loop exit
PB: predicated region body
PF: predicated region fallthrough
CT: control target
= control target key end

     0   :  { %v395_v0 = vmov 0.0|0.0   ;;  %vm396_vm0 = vmmov 0   ;;  %v397_v8 = vmov 0.0   ;;  %s560_s2 = inlined_call_operand.vmem [shape: f32[128,128], index: 2, kind: input, shape index: {}]   ;;  %s561_s1 = inlined_call_operand.vmem [shape: f32[128,128], index: 1, kind: input, shape index: {}]   ;;  %s562_s0 = inlined_call_operand.vmem [shape: f32[8,128], index: 0, kind: input, shape index: {}]   ;;  %s563_s3 = inlined_call_operand.vmem [shape: f32[1,128], index: 3, kind: input, shape index: {}]   ;;  %s564_s4 = inlined_call_operand.vmem [shape: f32[1,128], index: 4, kind: input, shape index: {}]   ;;  %s565_s5 = inlined_call_operand.vmem [shape: f32[1,128], index: 5, kind: input, shape index: {}]   ;;  %s566_s6 = inlined_call_operand.vmem [shape: f32[8,128], index: 6, kind: output, shape index: {}]  }
   0x1   :  { %344 = vmatprep.subr.bf16.mxu0 %v395_v0  ;;  %v54_v1 = vld [vmem:[%s560_s2] sm:$0xff]  ;;  %v55_v2 = vld [vmem:[%s560_s2 + $0x8] sm:$0xff]  ;;  %368 = vmatprep.subr.bf16.mxu1 %v395_v0  ;;  %v56_v6 = vld [vmem:[%s560_s2 + $0x10] sm:$0xff] }
   0x2   :  { %v38_v3 = vld [vmem:[%s561_s1] sm:$0xff]  ;;  %v345_v4 = vpack.c.bf16 %v55_v2, %v54_v1  ;;  %v39_v5 = vld [vmem:[%s561_s1 + $0x8] sm:$0xff]  ;;  %v57_v7 = vld [vmem:[%s560_s2 + $0x18] sm:$0xff]  ;;  %306 = vmatprep.mubr.msk.f32.mxu0 %vm396_vm0, %v397_v8  ;;  %341 = vmatprep.mubr.msk.f32.mxu1 %vm396_vm0, %v397_v8 }
   0x3   :  { %v369_v9 = vpack.c.bf16 %v39_v5, %v38_v3  ;;  %v40_v10 = vld [vmem:[%s561_s1 + $0x10] sm:$0xff]  ;;  %v41_v11 = vld [vmem:[%s561_s1 + $0x18] sm:$0xff]  ;;  %v348_v12 = vpack.c.bf16 %v57_v7, %v56_v6  ;;  %v58_v14 = vld [vmem:[%s560_s2 + $0x20] sm:$0xff] }
   0x4   :  { %346 = vmatpush3.bf16.msra.mxu0 %v345_v4  ;;  %v372_v13 = vpack.c.bf16 %v41_v11, %v40_v10  ;;  %v59_v15 = vld [vmem:[%s560_s2 + $0x28] sm:$0xff]  ;;  %v42_v16 = vld [vmem:[%s561_s1 + $0x20] sm:$0xff]  ;;  %v60_v20 = vld [vmem:[%s560_s2 + $0x30] sm:$0xff] }
   0x5   :  { %370 = vmatpush3.bf16.msra.mxu1 %v369_v9  ;;  %347 = vmatprep.subr.bf16.mxu0 %v395_v0  ;;  %v43_v17 = vld [vmem:[%s561_s1 + $0x28] sm:$0xff]  ;;  %v351_v18 = vpack.c.bf16 %v59_v15, %v58_v14  ;;  %v61_v21 = vld [vmem:[%s560_s2 + $0x38] sm:$0xff]  ;;  %v44_v22 = vld [vmem:[%s561_s1 + $0x30] sm:$0xff] }
   0x6   :  { %371 = vmatprep.subr.bf16.mxu1 %v395_v0  ;;  %v375_v19 = vpack.c.bf16 %v43_v17, %v42_v16  ;;  %v45_v23 = vld [vmem:[%s561_s1 + $0x38] sm:$0xff]  ;;  %v354_v24 = vpack.c.bf16 %v61_v21, %v60_v20  ;;  %v62_v26 = vld [vmem:[%s560_s2 + $0x40] sm:$0xff]  ;;  %v63_v27 = vld [vmem:[%s560_s2 + $0x48] sm:$0xff] }
   0x7   :  { %v378_v25 = vpack.c.bf16 %v45_v23, %v44_v22  ;;  %v46_v28 = vld [vmem:[%s561_s1 + $0x40] sm:$0xff]  ;;  %v47_v29 = vld [vmem:[%s561_s1 + $0x48] sm:$0xff]  ;;  %v357_v30 = vpack.c.bf16 %v63_v27, %v62_v26  ;;  %v64_v32 = vld [vmem:[%s560_s2 + $0x50] sm:$0xff] }
   0x8   :  { %349 = vmatpush3.bf16.msra.mxu0 %v348_v12  ;;  %v381_v31 = vpack.c.bf16 %v47_v29, %v46_v28  ;;  %v65_v33 = vld [vmem:[%s560_s2 + $0x58] sm:$0xff]  ;;  %v48_v34 = vld [vmem:[%s561_s1 + $0x50] sm:$0xff]  ;;  %v66_v38 = vld [vmem:[%s560_s2 + $0x60] sm:$0xff] }
   0x9   :  { %373 = vmatpush3.bf16.msra.mxu1 %v372_v13  ;;  %350 = vmatprep.subr.bf16.mxu0 %v395_v0  ;;  %v49_v35 = vld [vmem:[%s561_s1 + $0x58] sm:$0xff]  ;;  %v360_v36 = vpack.c.bf16 %v65_v33, %v64_v32  ;;  %v67_v39 = vld [vmem:[%s560_s2 + $0x68] sm:$0xff]  ;;  %v50_v40 = vld [vmem:[%s561_s1 + $0x60] sm:$0xff] }
   0xa   :  { %374 = vmatprep.subr.bf16.mxu1 %v395_v0  ;;  %v384_v37 = vpack.c.bf16 %v49_v35, %v48_v34  ;;  %v51_v41 = vld [vmem:[%s561_s1 + $0x68] sm:$0xff]  ;;  %v363_v42 = vpack.c.bf16 %v67_v39, %v66_v38  ;;  %v68_v44 = vld [vmem:[%s560_s2 + $0x70] sm:$0xff]  ;;  %v69_v45 = vld [vmem:[%s560_s2 + $0x78] sm:$0xff] }
   0xb   :  { %v387_v43 = vpack.c.bf16 %v51_v41, %v50_v40  ;;  %v52_v46 = vld [vmem:[%s561_s1 + $0x70] sm:$0xff]  ;;  %v53_v47 = vld [vmem:[%s561_s1 + $0x78] sm:$0xff]  ;;  %v366_v48 = vpack.c.bf16 %v69_v45, %v68_v44  ;;  %v28_v49 = vld [vmem:[%s562_s0] sm:$0xff] }
   0xc   :  { %352 = vmatpush3.bf16.msra.mxu0 %v351_v18  ;;  %v237_v50 = vld [vmem:[%s563_s3] ss:$0 sm:$0xff]  ;;  %v390_v51 = vpack.c.bf16 %v53_v47, %v52_v46 }
   0xd   :  { %376 = vmatpush3.bf16.msra.mxu1 %v375_v19  ;;  %353 = vmatprep.subr.bf16.mxu0 %v395_v0  ;;  %v36_v52 = vmul.f32 %v237_v50, %v28_v49  ;;  %v238_v53 = vld [vmem:[%s564_s4] ss:$0 sm:$0xff] }
   0xe   :  { %377 = vmatprep.subr.bf16.mxu1 %v395_v0  ;;  %v239_v58 = vld [vmem:[%s565_s5] ss:$0 sm:$0xff] }
  0x10   :  { %355 = vmatpush3.bf16.msra.mxu0 %v354_v24 }
  0x11   :  { %379 = vmatpush3.bf16.msra.mxu1 %v378_v25  ;;  %356 = vmatprep.subr.bf16.mxu0 %v395_v0 }
  0x12   :  { %380 = vmatprep.subr.bf16.mxu1 %v395_v0 }
  0x14   :  { %358 = vmatpush3.bf16.msra.mxu0 %v357_v30 }
  0x15   :  { %382 = vmatpush3.bf16.msra.mxu1 %v381_v31  ;;  %359 = vmatprep.subr.bf16.mxu0 %v395_v0 }
  0x16   :  { %383 = vmatprep.subr.bf16.mxu1 %v395_v0 }
  0x18   :  { %361 = vmatpush3.bf16.msra.mxu0 %v360_v36 }
  0x19   :  { %385 = vmatpush3.bf16.msra.mxu1 %v384_v37  ;;  %362 = vmatprep.subr.bf16.mxu0 %v395_v0 }
  0x1a   :  { %386 = vmatprep.subr.bf16.mxu1 %v395_v0 }
  0x1c   :  { %364 = vmatpush3.bf16.msra.mxu0 %v363_v42 }
  0x1d   :  { %388 = vmatpush3.bf16.msra.mxu1 %v387_v43  ;;  %365 = vmatprep.subr.bf16.mxu0 %v395_v0 }
  0x1e   :  { %389 = vmatprep.subr.bf16.mxu1 %v395_v0 }
  0x20   :  { %367 = vmatpush3.bf16.msra.mxu0 %v366_v48 }
  0x21   :  { %391 = vmatpush3.bf16.msra.mxu1 %v390_v51 }
  0x23   :  { %307 = vmatmul.mubr.f32.vlgmr.msra.gmra.mrb[0].mxu0 %v36_v52 }
  0x24   :  { %342 = vmatmul.mubr.f32.vlgmr.msra.gmra.mrb[0].mxu1 %v28_v49 }
  0xf6   :  { %v136_v54 = vpop.f32.mrb[0].mxu0 }
  0xf7   :  { %v147_v55 = vmul.f32 %v238_v53, %v136_v54  ;;  %v308_v56 = vpop.f32.mrb[1].mxu0  ;;  %v214_v57 = vpop.f32.mrb[0].mxu1 }
  0xf8   :  { %v343_v59 = vpop.f32.mrb[1].mxu1 }
  0xf9   :  { %v215_v60 = vadd.f32 %v214_v57, %v147_v55 }
  0xfb   :  { %v231_v61 = vadd.f32 %v239_v58, %v215_v60 }
  0xfd   :  { %232 = vst [vmem:[%s566_s6] sm:$0xff] %v231_v61 }

</bundles_post_ra>
